<compile_context>
chip_gen: v6e
topology: v6e:2x2x1
jax: 0.10.0
libtpu: 0.0.40
codegen_flags: <defaults>
</compile_context>

<pallas_src>
import functools

import jax
import jax.numpy as jnp
from jax.experimental import pallas as pl
from jax.experimental.pallas import tpu as pltpu


_B_PAD = 8      # sublane padding for the batch/M dimension
_LANE = 128     # lane width


def _round_up(x, m):
    return (x + m - 1) // m * m


# ----------------------------------------------------------------------------
# Fused kernel: one pass over the point features.
#   grid = (num_tiles,)      (reduction axis -> "arbitrary")
#   acc_ref : VMEM f32 [B_pad, D_pad] segment-sum accumulator (resident).
#   Epilogue (last step): divide by counts, run the 3-layer MLP, write logits.
# ----------------------------------------------------------------------------
def _fused_pool_mlp_kernel(starts_ref, ends_ref, feat_ref,
                           w1_ref, b1_ref, s1_ref, t1_ref,
                           w2_ref, b2_ref, s2_ref, t2_ref,
                           w3_ref, b3_ref,
                           out_ref, acc_ref, *, n_total):
    t = pl.program_id(0)
    tn = feat_ref.shape[0]          # rows per feat tile (static)
    b_pad = acc_ref.shape[0]

    @pl.when(t == 0)
    def _():
        acc_ref[...] = jnp.zeros_like(acc_ref)

    starts = starts_ref[...]                    # [B_pad, 1] int32
    ends = ends_ref[...]                        # [B_pad, 1] int32

    # Global row ids for this tile (NOT local block indices).
    row0 = t * tn
    rows = row0 + jax.lax.broadcasted_iota(jnp.int32, (b_pad, tn), 1)
    # Mask in the *feature* dtype so the mask-matmul is a single bf16 MXU pass.
    mask = ((rows >= starts) & (rows < ends)).astype(feat_ref.dtype)  # [B_pad, TN]

    f = feat_ref[...]
    if n_total % tn != 0:
        # Ragged last tile: rows >= n_total contain stale VMEM (possibly NaN).
        # Zero them explicitly before the dot -- masking alone is insufficient
        # because 0 * NaN = NaN on the MXU accumulation path.
        valid = (row0 + jax.lax.broadcasted_iota(jnp.int32, (tn, 1), 0)) < n_total
        f = jnp.where(valid, f, jnp.zeros_like(f))

    # Segment partial sums on the MXU, accumulated in f32.
    acc_ref[...] += jnp.dot(mask, f, preferred_element_type=jnp.float32)

    @pl.when(t == pl.num_programs(0) - 1)
    def _():
        counts = jnp.maximum(ends - starts, 1).astype(jnp.float32)    # [B_pad, 1]
        pooled = acc_ref[...] / counts                                # mean pool

        # cls_head MLP (BN(eval) folded into scale/shift; Dropout = identity).
        h = jnp.dot(pooled, w1_ref[...],
                    preferred_element_type=jnp.float32) + b1_ref[...]
        h = jnp.maximum(h * s1_ref[...] + t1_ref[...], 0.0)
        h = jnp.dot(h, w2_ref[...],
                    preferred_element_type=jnp.float32) + b2_ref[...]
        h = jnp.maximum(h * s2_ref[...] + t2_ref[...], 0.0)
        out_ref[...] = (jnp.dot(h, w3_ref[...],
                                preferred_element_type=jnp.float32)
                        + b3_ref[...])


# ----------------------------------------------------------------------------
# Wrapper: alignment bookkeeping + pallas_call.
# ----------------------------------------------------------------------------
@functools.partial(jax.jit, static_argnames=("num_classes", "tile_n"))
def default_classifier_forward(feat, offset, params, num_classes, tile_n=1024):
    """Inference path of DefaultClassifier (backbone output -> cls_logits).

    `feat` may be bf16 (recommended: halves the dominant HBM stream) or f32;
    accumulation is always f32.
    """
    n, d = feat.shape
    b = offset.shape[0]

    d_pad = _round_up(d, _LANE)
    c_pad = _round_up(num_classes, _LANE)
    b_pad = _round_up(max(b, _B_PAD), _B_PAD)

    # Effective feat tile: if all points fit in one tile, use a block equal to
    # the full N extent (always legal, no tail handling needed); otherwise use
    # tile_n-row blocks with a ragged last tile handled in-kernel.
    tile_rows = n if n <= tile_n else tile_n
    num_tiles = (n + tile_rows - 1) // tile_rows

    # nn.functional.pad(point.offset, (1, 0)) -> CSR indptr -> [start, end).
    indptr = jnp.concatenate([jnp.zeros((1,), jnp.int32),
                              offset.astype(jnp.int32)])
    starts = indptr[:-1]
    ends = indptr[1:]
    # Extra (padding) batch rows are empty segments: start == end == 0.
    pad_b = b_pad - b
    starts = jnp.concatenate(
        [starts, jnp.zeros((pad_b,), jnp.int32)]).reshape(b_pad, 1)
    ends = jnp.concatenate(
        [ends, jnp.zeros((pad_b,), jnp.int32)]).reshape(b_pad, 1)

    # No N-padding of feat (that was a full extra HBM read+write).  Only pad
    # the feature (lane) dim if it isn't already 128-aligned.
    if d_pad != d:
        feat = jnp.pad(feat, ((0, 0), (0, d_pad - d)))
        w1 = jnp.pad(params["w1"], ((0, d_pad - d), (0, 0)))
    else:
        w1 = params["w1"]
    # Pad the class dim so the logits store is one unmasked (8,128) slab.
    w3 = jnp.pad(params["w3"], ((0, 0), (0, c_pad - num_classes)))
    b3 = jnp.pad(params["b3"], ((0, 0), (0, c_pad - num_classes)))

    operands = (starts, ends, feat,
                w1, params["b1"], params["s1"], params["t1"],
                params["w2"], params["b2"], params["s2"], params["t2"],
                w3, b3)

    def const_spec(arr):
        # Full-array block, constant block index -> stays resident across grid.
        return pl.BlockSpec(arr.shape, lambda *_: (0,) * arr.ndim)

    in_specs = [const_spec(starts), const_spec(ends),
                pl.BlockSpec((tile_rows, d_pad), lambda t: (t, 0))]
    in_specs += [const_spec(a) for a in operands[3:]]

    kernel = functools.partial(_fused_pool_mlp_kernel, n_total=n)

    logits_pad = pl.pallas_call(
        kernel,
        out_shape=jax.ShapeDtypeStruct((b_pad, c_pad), jnp.float32),
        grid=(num_tiles,),
        in_specs=in_specs,
        out_specs=pl.BlockSpec((b_pad, c_pad), lambda t: (0, 0)),
        scratch_shapes=[pltpu.VMEM((b_pad, d_pad), jnp.float32)],
        compiler_params=pltpu.CompilerParams(
            dimension_semantics=("arbitrary",),        # reduction axis
            vmem_limit_bytes=32 * 1024 * 1024),        # ample, portable budget
    )(*operands)

    return logits_pad[:b, :num_classes]


# ----------------------------------------------------------------------------
# Parameter construction (deterministic, in-script) and BN folding.
# ----------------------------------------------------------------------------
def make_params(key, embed_dim, num_classes):
    dims = [(embed_dim, 256), (256, 128), (128, num_classes)]
    keys = jax.random.split(key, 16)
    p = {}
    ki = 0
    for layer, (fan_in, fan_out) in enumerate(dims, start=1):
        bound = 1.0 / jnp.sqrt(fan_in)
        w = jax.random.uniform(keys[ki], (fan_in, fan_out), jnp.float32,
                               -bound, bound); ki += 1
        bias = jax.random.uniform(keys[ki], (1, fan_out), jnp.float32,
                                  -bound, bound); ki += 1
        p[f"w{layer}"] = w
        p[f"b{layer}"] = bias

    # BatchNorm1d (eval) running stats / affine params for the two hidden
    # layers, folded into scale (s) / shift (t):  y = x * s + t
    eps = 1e-5
    for layer, width in ((1, 256), (2, 128)):
        gamma = 1.0 + 0.01 * jax.random.normal(keys[ki], (1, width)); ki += 1
        beta = 0.01 * jax.random.normal(keys[ki], (1, width)); ki += 1
        running_mean = 0.05 * jax.random.normal(keys[ki], (1, width)); ki += 1
        running_var = 1.0 + 0.1 * jax.random.uniform(keys[ki], (1, width)); ki += 1
        scale = gamma / jnp.sqrt(running_var + eps)
        shift = beta - running_mean * scale
        p[f"s{layer}"] = scale.astype(jnp.float32)
        p[f"t{layer}"] = shift.astype(jnp.float32)
    return p


# ----------------------------------------------------------------------------
# Pure-JAX reference for verification.
# ----------------------------------------------------------------------------
def reference_forward(feat, offset, params, num_classes):
    indptr = jnp.concatenate([jnp.zeros((1,), jnp.int32),
                              offset.astype(jnp.int32)])
    b = offset.shape[0]
    n = feat.shape[0]
    rows = jnp.arange(n)[:, None]
    pooled = []
    for i in range(b):
        mask = (rows >= indptr[i]) & (rows < indptr[i + 1])
        cnt = jnp.maximum(indptr[i + 1] - indptr[i], 1).astype(feat.dtype)
        pooled.append(jnp.sum(jnp.where(mask, feat, 0.0), axis=0) / cnt)
    x = jnp.stack(pooled, axis=0)
    h = x @ params["w1"] + params["b1"]
    h = jnp.maximum(h * params["s1"] + params["t1"], 0.0)
    h = h @ params["w2"] + params["b2"]
    h = jnp.maximum(h * params["s2"] + params["t2"], 0.0)
    return h @ params["w3"] + params["b3"]


if __name__ == "__main__":
    # Small shapes consistent with the module's forward:
    #   B = 2 point clouds, N = 300 total points (not a tile multiple, to
    #   exercise the ragged-tail path), embed_dim = 256 (module default),
    #   40 classes.
    B = 2
    N = 300
    EMBED_DIM = 256
    NUM_CLASSES = 40

    key = jax.random.PRNGKey(0)
    k_feat, k_params = jax.random.split(key)

    feat_f32 = jax.random.normal(k_feat, (N, EMBED_DIM), jnp.float32)
    # Stream features in bf16 (what the backbone would hand over); the kernel
    # accumulates in f32 via preferred_element_type.
    feat = feat_f32.astype(jnp.bfloat16)
    # offset = cumulative point counts per cloud (segment boundaries);
    # segment 0 ends mid-tile so the mask crosses a tile boundary.
    offset = jnp.array([130, N], dtype=jnp.int32)

    params = make_params(k_params, EMBED_DIM, NUM_CLASSES)

    # Default (large-tile) path: a single feat tile covers all N points.
    logits = default_classifier_forward(feat, offset, params, NUM_CLASSES)
    logits = jax.block_until_ready(logits)

    # Small-tile path: exercises multi-tile accumulation, a segment boundary
    # crossing a tile boundary, and the in-kernel ragged last-tile zeroing.
    logits_small = default_classifier_forward(feat, offset, params,
                                              NUM_CLASSES, tile_n=128)
    logits_small = jax.block_until_ready(logits_small)

    # Reference on the same (bf16-rounded) features, in f32.
    ref = reference_forward(feat.astype(jnp.float32), offset, params,
                            NUM_CLASSES)

    assert logits.shape == (B, NUM_CLASSES), logits.shape
    assert logits_small.shape == (B, NUM_CLASSES), logits_small.shape
    # MXU accumulation order / default TPU matmul precision differ slightly
    # from the pure-JAX reference sums, so use a relaxed tolerance.
    assert jnp.allclose(logits, ref, atol=1e-2, rtol=1e-2), (
        "mismatch vs reference (default tile)")
    assert jnp.allclose(logits_small, ref, atol=1e-2, rtol=1e-2), (
        "mismatch vs reference (small tile)")

    print("KERNEL_OK")
</pallas_src>

<mosaic_0001>
module attributes {stable_mosaic.version = 11 : i64} {
  func.func @_fused_pool_mlp_kernel(%arg0: i32, %arg1: memref<8x1xi32, #tpu.memory_space<vmem>>, %arg2: memref<8x1xi32, #tpu.memory_space<vmem>>, %arg3: memref<300x256xbf16, #tpu.memory_space<vmem>>, %arg4: memref<256x256xf32, #tpu.memory_space<vmem>>, %arg5: memref<1x256xf32, #tpu.memory_space<vmem>>, %arg6: memref<1x256xf32, #tpu.memory_space<vmem>>, %arg7: memref<1x256xf32, #tpu.memory_space<vmem>>, %arg8: memref<256x128xf32, #tpu.memory_space<vmem>>, %arg9: memref<1x128xf32, #tpu.memory_space<vmem>>, %arg10: memref<1x128xf32, #tpu.memory_space<vmem>>, %arg11: memref<1x128xf32, #tpu.memory_space<vmem>>, %arg12: memref<128x128xf32, #tpu.memory_space<vmem>>, %arg13: memref<1x128xf32, #tpu.memory_space<vmem>>, %arg14: memref<8x128xf32, #tpu.memory_space<vmem>>, %arg15: memref<8x256xf32, #tpu.memory_space<vmem>>) attributes {dimension_semantics = [#tpu.dimension_semantics<arbitrary>], iteration_bounds = array<i64: 1>, scalar_prefetch = 0 : i64, scratch_operands = 1 : i64, tpu.core_type = #tpu.core_type<tc>, window_params = [{pipeline_mode = #tpu.pipeline_mode<synchronous>, transform_indices = @transform_0, window_bounds = array<i64: 8, 1>}, {pipeline_mode = #tpu.pipeline_mode<synchronous>, transform_indices = @transform_1, window_bounds = array<i64: 8, 1>}, {transform_indices = @transform_2, window_bounds = array<i64: 300, 256>}, {pipeline_mode = #tpu.pipeline_mode<synchronous>, transform_indices = @transform_3, window_bounds = array<i64: 256, 256>}, {pipeline_mode = #tpu.pipeline_mode<synchronous>, transform_indices = @transform_4, window_bounds = array<i64: 1, 256>}, {pipeline_mode = #tpu.pipeline_mode<synchronous>, transform_indices = @transform_5, window_bounds = array<i64: 1, 256>}, {pipeline_mode = #tpu.pipeline_mode<synchronous>, transform_indices = @transform_6, window_bounds = array<i64: 1, 256>}, {pipeline_mode = #tpu.pipeline_mode<synchronous>, transform_indices = @transform_7, window_bounds = array<i64: 256, 128>}, {pipeline_mode = #tpu.pipeline_mode<synchronous>, transform_indices = @transform_8, window_bounds = array<i64: 1, 128>}, {pipeline_mode = #tpu.pipeline_mode<synchronous>, transform_indices = @transform_9, window_bounds = array<i64: 1, 128>}, {pipeline_mode = #tpu.pipeline_mode<synchronous>, transform_indices = @transform_10, window_bounds = array<i64: 1, 128>}, {pipeline_mode = #tpu.pipeline_mode<synchronous>, transform_indices = @transform_11, window_bounds = array<i64: 128, 128>}, {pipeline_mode = #tpu.pipeline_mode<synchronous>, transform_indices = @transform_12, window_bounds = array<i64: 1, 128>}, {pipeline_mode = #tpu.pipeline_mode<synchronous>, transform_indices = @transform_13, window_bounds = array<i64: 8, 128>}]} {
    %c0_i32 = arith.constant 0 : i32
    %0 = arith.cmpi eq, %arg0, %c0_i32 : i32
    %1 = arith.extui %0 : i1 to i32
    %c0_i32_0 = arith.constant 0 : i32
    %2 = arith.cmpi ne, %1, %c0_i32_0 : i32
    scf.if %2 {
      %cst_12 = arith.constant 0.000000e+00 : f32
      %25 = vector.broadcast %cst_12 : f32 to vector<8x256xf32>
      %c0_13 = arith.constant 0 : index
      %c0_14 = arith.constant 0 : index
      %26 = vector.load %arg15[%c0_13, %c0_14] : memref<8x256xf32, #tpu.memory_space<vmem>>, vector<8x256xf32>
      tpu.vector_store %arg15[%c0_13, %c0_14], %25 {strides = array<i32>} : memref<8x256xf32, #tpu.memory_space<vmem>>, vector<8x256xf32>,
    } else {
    }
    %c0 = arith.constant 0 : index
    %c0_1 = arith.constant 0 : index
    %3 = vector.load %arg1[%c0, %c0_1] : memref<8x1xi32, #tpu.memory_space<vmem>>, vector<8x1xi32>
    %c0_2 = arith.constant 0 : index
    %c0_3 = arith.constant 0 : index
    %4 = vector.load %arg2[%c0_2, %c0_3] : memref<8x1xi32, #tpu.memory_space<vmem>>, vector<8x1xi32>
    %c300_i32 = arith.constant 300 : i32
    %5 = arith.muli %arg0, %c300_i32 : i32
    %6 = tpu.iota {dimensions = array<i32: 1>} : vector<8x300xi32>
    %7 = vector.broadcast %5 : i32 to vector<8x300xi32>
    %8 = arith.addi %7, %6 : vector<8x300xi32>
    %9 = vector.broadcast %3 : vector<8x1xi32> to vector<8x300xi32>
    %10 = arith.cmpi sge, %8, %9 : vector<8x300xi32>
    %11 = vector.broadcast %4 : vector<8x1xi32> to vector<8x300xi32>
    %12 = arith.cmpi slt, %8, %11 : vector<8x300xi32>
    %13 = arith.andi %10, %12 : vector<8x300xi1>
    %14 = arith.extui %13 : vector<8x300xi1> to vector<8x300xi32>
    %15 = arith.sitofp %14 : vector<8x300xi32> to vector<8x300xf32>
    %16 = arith.truncf %15 : vector<8x300xf32> to vector<8x300xbf16>
    %c0_4 = arith.constant 0 : index
    %c0_5 = arith.constant 0 : index
    %17 = vector.load %arg3[%c0_4, %c0_5] : memref<300x256xbf16, #tpu.memory_space<vmem>>, vector<300x256xbf16>
    %c0_6 = arith.constant 0 : index
    %c0_7 = arith.constant 0 : index
    %18 = vector.load %arg15[%c0_6, %c0_7] : memref<8x256xf32, #tpu.memory_space<vmem>>, vector<8x256xf32>
    %cst = arith.constant dense<0.000000e+00> : vector<8x256xf32>
    %19 = tpu.matmul %16, %17, %cst {dimension_numbers = #tpu.dot_dimension_numbers<[1], [0], [0], [1], [0, 0, 1, 1], [], []>} : vector<8x300xbf16>, vector<300x256xbf16>, vector<8x256xf32> -> vector<8x256xf32>
    %20 = arith.addf %18, %19 : vector<8x256xf32>
    %c0_8 = arith.constant 0 : index
    %c0_9 = arith.constant 0 : index
    %21 = vector.load %arg15[%c0_8, %c0_9] : memref<8x256xf32, #tpu.memory_space<vmem>>, vector<8x256xf32>
    tpu.vector_store %arg15[%c0_8, %c0_9], %20 {strides = array<i32>} : memref<8x256xf32, #tpu.memory_space<vmem>>, vector<8x256xf32>,
    %c0_i32_10 = arith.constant 0 : i32
    %22 = arith.cmpi eq, %arg0, %c0_i32_10 : i32
    %23 = arith.extui %22 : i1 to i32
    %c0_i32_11 = arith.constant 0 : i32
    %24 = arith.cmpi ne, %23, %c0_i32_11 : i32
    scf.if %24 {
      %25 = arith.subi %4, %3 : vector<8x1xi32>
      %c1_i32 = arith.constant 1 : i32
      %26 = vector.broadcast %c1_i32 : i32 to vector<8x1xi32>
      %27 = arith.maxsi %25, %26 : vector<8x1xi32>
      %28 = arith.sitofp %27 : vector<8x1xi32> to vector<8x1xf32>
      %c0_12 = arith.constant 0 : index
      %c0_13 = arith.constant 0 : index
      %29 = vector.load %arg15[%c0_12, %c0_13] : memref<8x256xf32, #tpu.memory_space<vmem>>, vector<8x256xf32>
      %30 = vector.broadcast %28 : vector<8x1xf32> to vector<8x256xf32>
      %31 = arith.divf %29, %30 : vector<8x256xf32>
      %c0_14 = arith.constant 0 : index
      %c0_15 = arith.constant 0 : index
      %32 = vector.load %arg4[%c0_14, %c0_15] : memref<256x256xf32, #tpu.memory_space<vmem>>, vector<256x256xf32>
      %cst_16 = arith.constant dense<0.000000e+00> : vector<8x256xf32>
      %33 = tpu.matmul %31, %32, %cst_16 {dimension_numbers = #tpu.dot_dimension_numbers<[1], [0], [0], [1], [0, 0, 1, 1], [], []>} : vector<8x256xf32>, vector<256x256xf32>, vector<8x256xf32> -> vector<8x256xf32>
      %c0_17 = arith.constant 0 : index
      %c0_18 = arith.constant 0 : index
      %34 = vector.load %arg5[%c0_17, %c0_18] : memref<1x256xf32, #tpu.memory_space<vmem>>, vector<1x256xf32>
      %35 = vector.broadcast %34 : vector<1x256xf32> to vector<8x256xf32>
      %36 = arith.addf %33, %35 : vector<8x256xf32>
      %c0_19 = arith.constant 0 : index
      %c0_20 = arith.constant 0 : index
      %37 = vector.load %arg6[%c0_19, %c0_20] : memref<1x256xf32, #tpu.memory_space<vmem>>, vector<1x256xf32>
      %38 = vector.broadcast %37 : vector<1x256xf32> to vector<8x256xf32>
      %39 = arith.mulf %36, %38 : vector<8x256xf32>
      %c0_21 = arith.constant 0 : index
      %c0_22 = arith.constant 0 : index
      %40 = vector.load %arg7[%c0_21, %c0_22] : memref<1x256xf32, #tpu.memory_space<vmem>>, vector<1x256xf32>
      %41 = vector.broadcast %40 : vector<1x256xf32> to vector<8x256xf32>
      %42 = arith.addf %39, %41 : vector<8x256xf32>
      %cst_23 = arith.constant 0.000000e+00 : f32
      %43 = vector.broadcast %cst_23 : f32 to vector<8x256xf32>
      %44 = arith.maximumf %42, %43 : vector<8x256xf32>
      %c0_24 = arith.constant 0 : index
      %c0_25 = arith.constant 0 : index
      %45 = vector.load %arg8[%c0_24, %c0_25] : memref<256x128xf32, #tpu.memory_space<vmem>>, vector<256x128xf32>
      %cst_26 = arith.constant dense<0.000000e+00> : vector<8x128xf32>
      %46 = tpu.matmul %44, %45, %cst_26 {dimension_numbers = #tpu.dot_dimension_numbers<[1], [0], [0], [1], [0, 0, 1, 1], [], []>} : vector<8x256xf32>, vector<256x128xf32>, vector<8x128xf32> -> vector<8x128xf32>
      %c0_27 = arith.constant 0 : index
      %c0_28 = arith.constant 0 : index
      %47 = vector.load %arg9[%c0_27, %c0_28] : memref<1x128xf32, #tpu.memory_space<vmem>>, vector<1x128xf32>
      %48 = vector.broadcast %47 : vector<1x128xf32> to vector<8x128xf32>
      %49 = arith.addf %46, %48 : vector<8x128xf32>
      %c0_29 = arith.constant 0 : index
      %c0_30 = arith.constant 0 : index
      %50 = vector.load %arg10[%c0_29, %c0_30] : memref<1x128xf32, #tpu.memory_space<vmem>>, vector<1x128xf32>
      %51 = vector.broadcast %50 : vector<1x128xf32> to vector<8x128xf32>
      %52 = arith.mulf %49, %51 : vector<8x128xf32>
      %c0_31 = arith.constant 0 : index
      %c0_32 = arith.constant 0 : index
      %53 = vector.load %arg11[%c0_31, %c0_32] : memref<1x128xf32, #tpu.memory_space<vmem>>, vector<1x128xf32>
      %54 = vector.broadcast %53 : vector<1x128xf32> to vector<8x128xf32>
      %55 = arith.addf %52, %54 : vector<8x128xf32>
      %cst_33 = arith.constant 0.000000e+00 : f32
      %56 = vector.broadcast %cst_33 : f32 to vector<8x128xf32>
      %57 = arith.maximumf %55, %56 : vector<8x128xf32>
      %c0_34 = arith.constant 0 : index
      %c0_35 = arith.constant 0 : index
      %58 = vector.load %arg12[%c0_34, %c0_35] : memref<128x128xf32, #tpu.memory_space<vmem>>, vector<128x128xf32>
      %cst_36 = arith.constant dense<0.000000e+00> : vector<8x128xf32>
      %59 = tpu.matmul %57, %58, %cst_36 {dimension_numbers = #tpu.dot_dimension_numbers<[1], [0], [0], [1], [0, 0, 1, 1], [], []>} : vector<8x128xf32>, vector<128x128xf32>, vector<8x128xf32> -> vector<8x128xf32>
      %c0_37 = arith.constant 0 : index
      %c0_38 = arith.constant 0 : index
      %60 = vector.load %arg13[%c0_37, %c0_38] : memref<1x128xf32, #tpu.memory_space<vmem>>, vector<1x128xf32>
      %61 = vector.broadcast %60 : vector<1x128xf32> to vector<8x128xf32>
      %62 = arith.addf %59, %61 : vector<8x128xf32>
      %c0_39 = arith.constant 0 : index
      %c0_40 = arith.constant 0 : index
      %63 = vector.load %arg14[%c0_39, %c0_40] : memref<8x128xf32, #tpu.memory_space<vmem>>, vector<8x128xf32>
      tpu.vector_store %arg14[%c0_39, %c0_40], %62 {strides = array<i32>} : memref<8x128xf32, #tpu.memory_space<vmem>>, vector<8x128xf32>,
    } else {
    }
    return
  }
  func.func @transform_0(%arg0: i32) -> (i32, i32) {
    %c0_i32 = arith.constant 0 : i32
    %c0_i32_0 = arith.constant 0 : i32
    %c0_i32_1 = arith.constant 0 : i32
    return %c0_i32, %c0_i32_0 : i32, i32
  }
  func.func @transform_1(%arg0: i32) -> (i32, i32) {
    %c0_i32 = arith.constant 0 : i32
    %c0_i32_0 = arith.constant 0 : i32
    %c0_i32_1 = arith.constant 0 : i32
    return %c0_i32, %c0_i32_0 : i32, i32
  }
  func.func @transform_2(%arg0: i32) -> (i32, i32) {
    %c0_i32 = arith.constant 0 : i32
    %c0_i32_0 = arith.constant 0 : i32
    return %arg0, %c0_i32 : i32, i32
  }
  func.func @transform_3(%arg0: i32) -> (i32, i32) {
    %c0_i32 = arith.constant 0 : i32
    %c0_i32_0 = arith.constant 0 : i32
    %c0_i32_1 = arith.constant 0 : i32
    return %c0_i32, %c0_i32_0 : i32, i32
  }
  func.func @transform_4(%arg0: i32) -> (i32, i32) {
    %c0_i32 = arith.constant 0 : i32
    %c0_i32_0 = arith.constant 0 : i32
    %c0_i32_1 = arith.constant 0 : i32
    return %c0_i32, %c0_i32_0 : i32, i32
  }
  func.func @transform_5(%arg0: i32) -> (i32, i32) {
    %c0_i32 = arith.constant 0 : i32
    %c0_i32_0 = arith.constant 0 : i32
    %c0_i32_1 = arith.constant 0 : i32
    return %c0_i32, %c0_i32_0 : i32, i32
  }
  func.func @transform_6(%arg0: i32) -> (i32, i32) {
    %c0_i32 = arith.constant 0 : i32
    %c0_i32_0 = arith.constant 0 : i32
    %c0_i32_1 = arith.constant 0 : i32
    return %c0_i32, %c0_i32_0 : i32, i32
  }
  func.func @transform_7(%arg0: i32) -> (i32, i32) {
    %c0_i32 = arith.constant 0 : i32
    %c0_i32_0 = arith.constant 0 : i32
    %c0_i32_1 = arith.constant 0 : i32
    return %c0_i32, %c0_i32_0 : i32, i32
  }
  func.func @transform_8(%arg0: i32) -> (i32, i32) {
    %c0_i32 = arith.constant 0 : i32
    %c0_i32_0 = arith.constant 0 : i32
    %c0_i32_1 = arith.constant 0 : i32
    return %c0_i32, %c0_i32_0 : i32, i32
  }
  func.func @transform_9(%arg0: i32) -> (i32, i32) {
    %c0_i32 = arith.constant 0 : i32
    %c0_i32_0 = arith.constant 0 : i32
    %c0_i32_1 = arith.constant 0 : i32
    return %c0_i32, %c0_i32_0 : i32, i32
  }
  func.func @transform_10(%arg0: i32) -> (i32, i32) {
    %c0_i32 = arith.constant 0 : i32
    %c0_i32_0 = arith.constant 0 : i32
    %c0_i32_1 = arith.constant 0 : i32
    return %c0_i32, %c0_i32_0 : i32, i32
  }
  func.func @transform_11(%arg0: i32) -> (i32, i32) {
    %c0_i32 = arith.constant 0 : i32
    %c0_i32_0 = arith.constant 0 : i32
    %c0_i32_1 = arith.constant 0 : i32
    return %c0_i32, %c0_i32_0 : i32, i32
  }
  func.func @transform_12(%arg0: i32) -> (i32, i32) {
    %c0_i32 = arith.constant 0 : i32
    %c0_i32_0 = arith.constant 0 : i32
    %c0_i32_1 = arith.constant 0 : i32
    return %c0_i32, %c0_i32_0 : i32, i32
  }
  func.func @transform_13(%arg0: i32) -> (i32, i32) {
    %c0_i32 = arith.constant 0 : i32
    %c0_i32_0 = arith.constant 0 : i32
    %c0_i32_1 = arith.constant 0 : i32
    return %c0_i32, %c0_i32_0 : i32, i32
  }
}

</mosaic_0001>

<bundles_post_ra>
// kernel: default_classifier_forward.1
= control target key start
LH: loop header
LB: loop body
LE: loop exit
PB: predicated region body
PF: predicated region fallthrough
CT: control target
= control target key end

     0   :  { %18 = vsyncpa [#allocation4], 0  ;;  %s1417_s0 = inlined_call_operand.vmem [shape: s32[8,1], index: 0, kind: input, shape index: {}]   ;;  %s1418_s1 = inlined_call_operand.vmem [shape: s32[8,1], index: 1, kind: input, shape index: {}]   ;;  %s1419_s2 = inlined_call_operand.vmem [shape: bf16[300,256], index: 2, kind: input, shape index: {}]   ;;  %s1420_s3 = inlined_call_operand.hbm [shape: f32[256,256], index: 3, kind: input, shape index: {}]   ;;  %s1421_s4 = inlined_call_operand.vmem [shape: f32[1,256], index: 4, kind: input, shape index: {}]   ;;  %s1422_s5 = inlined_call_operand.vmem [shape: f32[1,256], index: 5, kind: input, shape index: {}]   ;;  %s1423_s6 = inlined_call_operand.vmem [shape: f32[1,256], index: 6, kind: input, shape index: {}]   ;;  %s1424_s7 = inlined_call_operand.hbm [shape: f32[256,128], index: 7, kind: input, shape index: {}]   ;;  %s1425_s8 = inlined_call_operand.vmem [shape: f32[1,128], index: 8, kind: input, shape index: {}]   ;;  %s1426_s9 = inlined_call_operand.vmem [shape: f32[1,128], index: 9, kind: input, shape index: {}]   ;;  %s1427_s10 = inlined_call_operand.vmem [shape: f32[1,128], index: 10, kind: input, shape index: {}]   ;;  %s1428_s11 = inlined_call_operand.vmem [shape: f32[128,128], index: 11, kind: input, shape index: {}]   ;;  %s1429_s12 = inlined_call_operand.vmem [shape: f32[1,128], index: 12, kind: input, shape index: {}]   ;;  %s1430_s13 = inlined_call_operand.vmem [shape: f32[8,128], index: 13, kind: output, shape index: {}]  }
   0x1   :  { %19 = vsyncpa [#allocation6], 0  ;;  %s1112_s25 = smov [#allocation3]  }
   0x2   :  { %s31_s26 = sshll.u32 %s1112_s25, 4  ;;  %s32_s26 = int_to_ptr.vmem [resolvable:$true] %s31_s26 }
   0x3   :  { %s1076_s27 = scalar_lea.vmem %s32_s26, 8192  ;;  %p1081_p1 = scmp.lt.s32.totalorder %s32_s26, %s32_s26 }
   0x4   :  { %p1077_p0 = scmp.ne.s32.totalorder %s32_s26, %s1076_s27  ;;  %p1082_p2 = scmp.lt.s32.totalorder %s1076_s27, %s1076_s27 }
   0x6   :  { %p1083_p3 = por %p1082_p2, %p1081_p1 }
   0x8   :  { %p1084_p4 = pnand %p1083_p3, %p1077_p0 }
   0xa   :  { %1087 = shalt.err (!%p1084_p4)
}
   0xb   :  { %s1113_s28 = smov 256   ;;  %s1114_s29 = smov 16  }
   0xc   :  { %37 = dma.hbm_to_vmem [thread:$0]  %s1420_s3, 8192, %s32_s26, [#allocation4], %s1113_s28, %s1113_s28, %s1114_s29  }
   0xd   :  { %s1115_s15 = smov [#allocation5]  }
   0xe   :  { %s49_s16 = sshll.u32 %s1115_s15, 4  ;;  %s50_s16 = int_to_ptr.vmem [resolvable:$true] %s49_s16 }
   0xf   :  { %s1096_s17 = scalar_lea.vmem %s50_s16, 4096  ;;  %p1101_p6 = scmp.lt.s32.totalorder %s50_s16, %s50_s16 }
  0x10   :  { %p1097_p5 = scmp.ne.s32.totalorder %s50_s16, %s1096_s17  ;;  %p1102_p7 = scmp.lt.s32.totalorder %s1096_s17, %s1096_s17 }
  0x12   :  { %p1103_p8 = por %p1102_p7, %p1101_p6 }
  0x14   :  { %p1104_p9 = pnand %p1103_p8, %p1097_p5 }
  0x16   :  { %1107 = shalt.err (!%p1104_p9)
}
  0x17   :  { %s1116_s18 = smov 128   ;;  %s1117_s19 = smov 8  }
  0x18   :  { %55 = dma.hbm_to_vmem [thread:$0]  %s1424_s7, 4096, %s50_s16, [#allocation6], %s1116_s18, %s1116_s18, %s1117_s19  }
  0x19   :  { %1108 = dma.done.wait [#allocation4], 8192  }
  0x1a   :  { %1109 = vsyncadd [#allocation4], 4294959104 }
  0x1b   :  { %1110 = dma.done.wait [#allocation6], 4096  }
  0x1c   :  { %1111 = vsyncadd [#allocation6], 4294963200  ;;  %v1118_v0 = vmov 0   ;;  %v79_v1 = vld [vmem:[%s1417_s0] sm:$0xff]  ;;  %v1009_v3 = vld [vmem:[%s1419_s2 + $0x74] ss:$8 sps:$4 sm:$0xff]   ;;  %v82_v46 = vlaneseq }
  0x1d   :  { %1007 = vset.pattern.permute.xlu0 %v1118_v0  ;;  %426 = vmatprep.mubr.bf16.mxu1 %v1118_v0  ;;  %v80_v2 = vld [vmem:[%s1418_s1] sm:$0xff]  ;;  %v1011_v4 = vld [vmem:[%s1419_s2 + $0x70] ss:$8 sps:$4 sm:$0xff]   ;;  %v1015_v8 = vld [vmem:[%s1419_s2 + $0x54] ss:$8 sps:$4 sm:$0xff]   ;;  %vm346_vm1 = vcmask 1045504  }
  0x1e   :  { %1008 = vset.pattern.permute.xlu1 %v1118_v0  ;;  %91 = vperm.xlu0 %1007, %v79_v1   ;;  %v1012_v5 = vld [vmem:[%s1419_s2 + $0x64] ss:$8 sps:$4 sm:$0xff]   ;;  %v1014_v6 = vld [vmem:[%s1419_s2 + $0x60] ss:$8 sps:$4 sm:$0xff]   ;;  %v442_v7 = vsub.s32 %v80_v2, %v79_v1  ;;  %v1017_v9 = vld [vmem:[%s1419_s2 + $0x50] ss:$8 sps:$4 sm:$0xff]  }
  0x1f   :  { %353 = vmatprep.subr.bf16.mxu0 %v1009_v3  ;;  %v1018_v10 = vld [vmem:[%s1419_s2 + $0x44] ss:$8 sps:$4 sm:$0xff]   ;;  %v1020_v13 = vld [vmem:[%s1419_s2 + $0x40] ss:$8 sps:$4 sm:$0xff]   ;;  %v1021_v14 = vld [vmem:[%s1419_s2 + $0x34] ss:$8 sps:$4 sm:$0xff]  }
  0x20   :  { %354 = vmatpush1.bf16.msra.mxu0 %v1011_v4  ;;  %vm443_vm0 = vcmp.gt.s32.totalorder %v442_v7, 1  ;;  %v1023_v15 = vld [vmem:[%s1419_s2 + $0x30] ss:$8 sps:$4 sm:$0xff]   ;;  %v1024_v16 = vld [vmem:[%s1419_s2 + $0x24] ss:$8 sps:$4 sm:$0xff]   ;;  %v83_v47 = vand.u32 127, %v82_v46 }
  0x21   :  { %355 = vmatprep.subr.bf16.mxu0 %v1012_v5  ;;  %v444_v11 = vsel %vm443_vm0, %v442_v7, 1  ;;  %v1026_v17 = vld [vmem:[%s1419_s2 + $0x20] ss:$8 sps:$4 sm:$0xff]   ;;  %v1051_v18 = vld [vmem:[%s1419_s2 + $0x124] ss:$8 sps:$4 sm:$0x3f]  }
  0x22   :  { %97 = vperm.xlu0 %1007, %v80_v2   ;;  %v445_v12 = vcvt.s32.f32 %v444_v11  ;;  %v1053_v19 = vld [vmem:[%s1419_s2 + $0x120] ss:$8 sps:$4 sm:$0x3f]   ;;  %v1027_v20 = vld [vmem:[%s1419_s2 + $0x14] ss:$8 sps:$4 sm:$0xff]   ;;  %904 = vmatprep.subr.msk.bf16.mxu1 %vm346_vm1, %v1051_v18  ;;  %v85_v49 = vadd.s32 256, %v83_v47 }
  0x23   :  { %v348_v21 = vsel %vm346_vm1, %v1053_v19, 0  ;;  %v1057_v22 = vld [vmem:[%s1419_s2 + $0x114] ss:$8 sps:$4 sm:$0xff]   ;;  %v1059_v23 = vld [vmem:[%s1419_s2 + $0x110] ss:$8 sps:$4 sm:$0xff]   ;;  %v84_v51 = vadd.s32 128, %v83_v47 }
  0x24   :  { %356 = vmatpush1.bf16.msra.mxu0 %v1014_v6  ;;  %450 = vperm.xlu1 %1008, %v445_v12   ;;  %v1029_v24 = vld [vmem:[%s1419_s2 + $0x10] ss:$8 sps:$4 sm:$0xff]   ;;  %v1030_v25 = vld [vmem:[%s1419_s2 + $0x4] ss:$8 sps:$4 sm:$0xff]   ;;  %v1065_v27 = vld [vmem:[%s1419_s2 + $0x100] ss:$8 sps:$4 sm:$0xff]  }
  0x25   :  { %357 = vmatprep.subr.bf16.mxu0 %v1015_v8  ;;  %405 = vmatpush1.bf16.msra.mxu1 %v348_v21  ;;  %v1063_v26 = vld [vmem:[%s1419_s2 + $0x104] ss:$8 sps:$4 sm:$0xff]   ;;  %v1032_v28 = vld [vmem:[%s1419_s2] ss:$8 sps:$4 sm:$0xff]   ;;  %v1033_v29 = vld [vmem:[%s1419_s2 + $0xf4] ss:$8 sps:$4 sm:$0xff]  }
  0x26   :  { %406 = vmatprep.subr.bf16.mxu1 %v1057_v22  ;;  %v487_v30 = vld [vmem:[#allocation3 + $0xf8] sm:$0xff]  ;;  %v1036_v32 = vld [vmem:[%s1419_s2 + $0xe4] ss:$8 sps:$4 sm:$0xff]   ;;  %v1038_v33 = vld [vmem:[%s1419_s2 + $0xe0] ss:$8 sps:$4 sm:$0xff]   ;;  %v1119_v53 = vmov 0.0  }
  0x27   :  { %v1035_v31 = vld [vmem:[%s1419_s2 + $0xf0] ss:$8 sps:$4 sm:$0xff]   ;;  %v1039_v34 = vld [vmem:[%s1419_s2 + $0xd4] ss:$8 sps:$4 sm:$0xff]   ;;  %v1042_v36 = vld [vmem:[%s1419_s2 + $0xc4] ss:$8 sps:$4 sm:$0xff]  }
  0x28   :  { %358 = vmatpush1.bf16.msra.mxu0 %v1017_v9  ;;  %v1041_v35 = vld [vmem:[%s1419_s2 + $0xd0] ss:$8 sps:$4 sm:$0xff]   ;;  %v1044_v37 = vld [vmem:[%s1419_s2 + $0xc0] ss:$8 sps:$4 sm:$0xff]   ;;  %v1045_v38 = vld [vmem:[%s1419_s2 + $0xb4] ss:$8 sps:$4 sm:$0xff]  }
  0x29   :  { %359 = vmatprep.subr.bf16.mxu0 %v1018_v10  ;;  %407 = vmatpush1.bf16.msra.mxu1 %v1059_v23  ;;  %v1047_v39 = vld [vmem:[%s1419_s2 + $0xb0] ss:$8 sps:$4 sm:$0xff]   ;;  %v1048_v40 = vld [vmem:[%s1419_s2 + $0xa4] ss:$8 sps:$4 sm:$0xff]   ;;  %v1050_v41 = vld [vmem:[%s1419_s2 + $0xa0] ss:$8 sps:$4 sm:$0xff]  }
  0x2a   :  { %408 = vmatprep.subr.bf16.mxu1 %v1063_v26  ;;  %v1054_v42 = vld [vmem:[%s1419_s2 + $0x94] ss:$8 sps:$4 sm:$0xff]   ;;  %v1056_v43 = vld [vmem:[%s1419_s2 + $0x90] ss:$8 sps:$4 sm:$0xff]   ;;  %v1060_v44 = vld [vmem:[%s1419_s2 + $0x84] ss:$8 sps:$4 sm:$0xff]  }
  0x2b   :  { %v1062_v45 = vld [vmem:[%s1419_s2 + $0x80] ss:$8 sps:$4 sm:$0xff]   ;;  %vm342_vm11 = vcmask 359424   ;;  %v486_v56 = vld [vmem:[#allocation3 + $0xf0] sm:$0xff]  ;;  %v1120_v58 = vmov 1.0|1.0  }
  0x2c   :  { %360 = vmatpush1.bf16.msra.mxu0 %v1020_v13  ;;  %v485_v57 = vld [vmem:[#allocation3 + $0xe8] sm:$0xff]  ;;  %v484_v59 = vld [vmem:[#allocation3 + $0xe0] sm:$0xff]  ;;  %v483_v60 = vld [vmem:[#allocation3 + $0xd8] sm:$0xff]  ;;  %vm1121_vm14 = vmmov 0  }
  0x2d   :  { %361 = vmatprep.subr.bf16.mxu0 %v1021_v14  ;;  %409 = vmatpush1.bf16.msra.mxu1 %v1065_v27  ;;  %v482_v61 = vld [vmem:[#allocation3 + $0xd0] sm:$0xff]  ;;  %v481_v62 = vld [vmem:[#allocation3 + $0xc8] sm:$0xff]  ;;  %v480_v63 = vld [vmem:[#allocation3 + $0xc0] sm:$0xff] }
  0x2e   :  { %532 = vmatprep.subr.mxu1 %v487_v30  ;;  %v479_v0 = vld [vmem:[#allocation3 + $0xb8] sm:$0xff]  ;;  %v478_v1 = vld [vmem:[#allocation3 + $0xb0] sm:$0xff]  ;;  %v477_v2 = vld [vmem:[#allocation3 + $0xa8] sm:$0xff] }
  0x2f   :  { %v476_v3 = vld [vmem:[#allocation3 + $0xa0] sm:$0xff]  ;;  %v475_v4 = vld [vmem:[#allocation3 + $0x98] sm:$0xff]  ;;  %v474_v5 = vld [vmem:[#allocation3 + $0x90] sm:$0xff] }
  0x30   :  { %362 = vmatpush1.bf16.msra.mxu0 %v1023_v15  ;;  %v473_v6 = vld [vmem:[#allocation3 + $0x88] sm:$0xff]  ;;  %v472_v7 = vld [vmem:[#allocation3 + $0x80] sm:$0xff]  ;;  %v471_v8 = vld [vmem:[#allocation3 + $0x78] sm:$0xff] }
  0x31   :  { %363 = vmatprep.subr.bf16.mxu0 %v1024_v16  ;;  %v470_v9 = vld [vmem:[#allocation3 + $0x70] sm:$0xff]  ;;  %v469_v10 = vld [vmem:[#allocation3 + $0x68] sm:$0xff]  ;;  %v468_v11 = vld [vmem:[#allocation3 + $0x60] sm:$0xff] }
  0x32   :  { %v467_v12 = vld [vmem:[#allocation3 + $0x58] sm:$0xff]  ;;  %v466_v13 = vld [vmem:[#allocation3 + $0x50] sm:$0xff]  ;;  %v465_v14 = vld [vmem:[#allocation3 + $0x48] sm:$0xff] }
  0x33   :  { %v464_v15 = vld [vmem:[#allocation3 + $0x40] sm:$0xff]  ;;  %v463_v16 = vld [vmem:[#allocation3 + $0x38] sm:$0xff]  ;;  %v461_v18 = vld [vmem:[#allocation3 + $0x28] sm:$0xff] }
  0x34   :  { %364 = vmatpush1.bf16.msra.mxu0 %v1026_v17  ;;  %v462_v17 = vld [vmem:[#allocation3 + $0x30] sm:$0xff]  ;;  %v460_v19 = vld [vmem:[#allocation3 + $0x20] sm:$0xff]  ;;  %v457_v22 = vld [vmem:[#allocation3 + $0x8] sm:$0xff] }
  0x35   :  { %365 = vmatprep.subr.bf16.mxu0 %v1027_v20  ;;  %v459_v20 = vld [vmem:[#allocation3 + $0x18] sm:$0xff]  ;;  %v458_v21 = vld [vmem:[#allocation3 + $0x10] sm:$0xff]  ;;  %v456_v23 = vld [vmem:[#allocation3] sm:$0xff] }
  0x36   :  { %v517_v26 = vld [vmem:[#allocation3 + $0x1e8] sm:$0xff]  ;;  %v516_v27 = vld [vmem:[#allocation3 + $0x1e0] sm:$0xff] }
  0x37   :  { %v513_v30 = vld [vmem:[#allocation3 + $0x1c8] sm:$0xff]  ;;  %v492_v52 = vld [vmem:[#allocation3 + $0x120] sm:$0xff] }
  0x38   :  { %366 = vmatpush1.bf16.msra.mxu0 %v1029_v24  ;;  %v519_v24 = vld [vmem:[#allocation3 + $0x1f8] sm:$0xff] }
  0x39   :  { %367 = vmatprep.subr.bf16.mxu0 %v1030_v25  ;;  %v518_v25 = vld [vmem:[#allocation3 + $0x1f0] sm:$0xff] }
  0x3c   :  { %368 = vmatpush1.bf16.msra.mxu0 %v1032_v28  ;;  %v515_v28 = vld [vmem:[#allocation3 + $0x1d8] sm:$0xff] }
  0x3d   :  { %369 = vmatprep.subr.bf16.mxu0 %v1033_v29  ;;  %v514_v29 = vld [vmem:[#allocation3 + $0x1d0] sm:$0xff] }
  0x40   :  { %370 = vmatpush2.bf16.msra.mxu0 %v1035_v31  ;;  %v512_v31 = vld [vmem:[#allocation3 + $0x1c0] sm:$0xff] }
  0x41   :  { %371 = vmatprep.subr.bf16.mxu0 %v1036_v32  ;;  %v511_v32 = vld [vmem:[#allocation3 + $0x1b8] sm:$0xff] }
  0x44   :  { %372 = vmatpush2.bf16.msra.mxu0 %v1038_v33  ;;  %v510_v33 = vld [vmem:[#allocation3 + $0x1b0] sm:$0xff] }
  0x45   :  { %373 = vmatprep.subr.bf16.mxu0 %v1039_v34  ;;  %v509_v34 = vld [vmem:[#allocation3 + $0x1a8] sm:$0xff] }
  0x48   :  { %374 = vmatpush2.bf16.msra.mxu0 %v1041_v35  ;;  %v508_v35 = vld [vmem:[#allocation3 + $0x1a0] sm:$0xff] }
  0x49   :  { %375 = vmatprep.subr.bf16.mxu0 %v1042_v36  ;;  %v507_v36 = vld [vmem:[#allocation3 + $0x198] sm:$0xff] }
  0x4c   :  { %376 = vmatpush2.bf16.msra.mxu0 %v1044_v37  ;;  %v506_v37 = vld [vmem:[#allocation3 + $0x190] sm:$0xff] }
  0x4d   :  { %377 = vmatprep.subr.bf16.mxu0 %v1045_v38  ;;  %v505_v38 = vld [vmem:[#allocation3 + $0x188] sm:$0xff] }
  0x50   :  { %378 = vmatpush2.bf16.msra.mxu0 %v1047_v39  ;;  %v504_v39 = vld [vmem:[#allocation3 + $0x180] sm:$0xff] }
  0x51   :  { %379 = vmatprep.subr.bf16.mxu0 %v1048_v40  ;;  %v503_v40 = vld [vmem:[#allocation3 + $0x178] sm:$0xff] }
  0x54   :  { %380 = vmatpush2.bf16.msra.mxu0 %v1050_v41  ;;  %v502_v41 = vld [vmem:[#allocation3 + $0x170] sm:$0xff] }
  0x55   :  { %381 = vmatprep.subr.bf16.mxu0 %v1054_v42  ;;  %v501_v42 = vld [vmem:[#allocation3 + $0x168] sm:$0xff] }
  0x58   :  { %382 = vmatpush2.bf16.msra.mxu0 %v1056_v43  ;;  %v500_v43 = vld [vmem:[#allocation3 + $0x160] sm:$0xff] }
  0x59   :  { %383 = vmatprep.subr.bf16.mxu0 %v1060_v44  ;;  %v499_v44 = vld [vmem:[#allocation3 + $0x158] sm:$0xff] }
  0x5c   :  { %384 = vmatpush2.bf16.msra.mxu0 %v1062_v45  ;;  %v498_v45 = vld [vmem:[#allocation3 + $0x150] sm:$0xff] }
  0x99   :  { %v92_v48 = vpop.permute.xlu0 %91 }
  0x9a   :  { %vm93_vm2 = vcmp.ge.s32.totalorder %v83_v47, %v92_v48  ;;  %vm95_vm5 = vcmp.ge.s32.totalorder %v85_v49, %v92_v48  ;;  %vm94_vm10 = vcmp.ge.s32.totalorder %v84_v51, %v92_v48  ;;  %v496_v48 = vld [vmem:[#allocation3 + $0x140] sm:$0xff] }
  0x9d   :  { %v98_v50 = vpop.permute.xlu0 %97 }
  0x9e   :  { %vm99_vm3 = vcmp.lt.s32.totalorder %v83_v47, %v98_v50  ;;  %vm101_vm4 = vcmp.lt.s32.totalorder %v85_v49, %v98_v50  ;;  %vm100_vm7 = vcmp.lt.s32.totalorder %v84_v51, %v98_v50  ;;  %v497_v47 = vld [vmem:[#allocation3 + $0x148] sm:$0xff]  ;;  %v495_v49 = vld [vmem:[#allocation3 + $0x138] sm:$0xff]  ;;  %v494_v50 = vld [vmem:[#allocation3 + $0x130] sm:$0xff] }
  0x9f   :  { %vm1319_vm6 = vmand %vm93_vm2, %vm99_vm3  ;;  %v493_v51 = vld [vmem:[#allocation3 + $0x128] sm:$0xff] }
  0xa0   :  { %vm104_vm8 = vmand %vm95_vm5, %vm101_vm4 }
  0xa1   :  { %v861_v54 = vsel %vm104_vm8, 1.0, %v1119_v53  ;;  %vm902_vm9 = vmpackc.low %vm1319_vm6, %vm1319_vm6 }
  0xa2   :  { %v113_v55 = vpack.c.bf16 %v861_v54, %v861_v54  ;;  %vm103_vm12 = vmand %vm94_vm10, %vm100_vm7  ;;  %v491_v54 = vld [vmem:[#allocation3 + $0x118] sm:$0xff] }
  0xa3   :  { %vm900_vm13 = vmpackc.low %vm103_vm12, %vm103_vm12 }
  0xa4   :  { %901 = vmatprep.mubr.msk.bf16.mxu0 %vm900_vm13, %v1120_v58  ;;  %905 = vmatmul.mubr.msk.bf16.vlgmr.msra.gmra.mxu1 %vm342_vm11, %v113_v55  ;;  %v490_v55 = vld [vmem:[#allocation3 + $0x110] sm:$0xff] }
  0xa5   :  { %903 = vmatmul.mubr.msk.bf16.vlgmr.msra.gmra.mxu0 %vm902_vm9, %v1120_v58  ;;  %533 = vmatpush1.msra.mxu1 %v486_v56  ;;  %v489_v56 = vld [vmem:[#allocation3 + $0x108] sm:$0xff]  ;;  %v664_v58 = vld [vmem:[#allocation5 + $0xf8] sm:$0xff] }
  0xa6   :  { %534 = vmatprep.subr.mxu1 %v485_v57  ;;  %v488_v57 = vld [vmem:[#allocation3 + $0x100] sm:$0xff]  ;;  %910 = vmatprep.subr.mxu0 %v664_v58 }
  0xa7   :  { %535 = vmatpush1.msra.mxu1 %v484_v59  ;;  %v648_v59 = vld [vmem:[#allocation5 + $0x78] sm:$0xff]  ;;  %v617_v58 = vld [vmem:[%s1423_s6] sm:$0x3] }
  0xa8   :  { %536 = vmatprep.subr.mxu1 %v483_v60  ;;  %v663_v60 = vld [vmem:[#allocation5 + $0xf0] sm:$0xff]  ;;  %911 = vmatpush3.msra.mxu0 %v648_v59 }
  0xa9   :  { %537 = vmatpush1.msra.mxu1 %v482_v61  ;;  %v647_v61 = vld [vmem:[#allocation5 + $0x70] sm:$0xff]  ;;  %912 = vmatprep.subr.mxu0 %v663_v60 }
  0xaa   :  { %538 = vmatprep.subr.mxu1 %v481_v62  ;;  %v662_v62 = vld [vmem:[#allocation5 + $0xe8] sm:$0xff]  ;;  %913 = vmatpush3.msra.mxu0 %v647_v61 }
  0xab   :  { %539 = vmatpush1.msra.mxu1 %v480_v63  ;;  %v646_v63 = vld [vmem:[#allocation5 + $0x68] sm:$0xff]  ;;  %914 = vmatprep.subr.mxu0 %v662_v62 }
  0xac   :  { %540 = vmatprep.subr.mxu1 %v479_v0  ;;  %v661_v0 = vld [vmem:[#allocation5 + $0xe0] sm:$0xff]  ;;  %915 = vmatpush3.msra.mxu0 %v646_v63 }
  0xad   :  { %541 = vmatpush1.msra.mxu1 %v478_v1  ;;  %v645_v1 = vld [vmem:[#allocation5 + $0x60] sm:$0xff]  ;;  %916 = vmatprep.subr.mxu0 %v661_v0 }
  0xae   :  { %542 = vmatprep.subr.mxu1 %v477_v2  ;;  %v660_v2 = vld [vmem:[#allocation5 + $0xd8] sm:$0xff]  ;;  %917 = vmatpush3.msra.mxu0 %v645_v1 }
  0xaf   :  { %543 = vmatpush1.msra.mxu1 %v476_v3  ;;  %v644_v3 = vld [vmem:[#allocation5 + $0x58] sm:$0xff]  ;;  %918 = vmatprep.subr.mxu0 %v660_v2 }
  0xb0   :  { %544 = vmatprep.subr.mxu1 %v475_v4  ;;  %v659_v4 = vld [vmem:[#allocation5 + $0xd0] sm:$0xff]  ;;  %919 = vmatpush3.msra.mxu0 %v644_v3 }
  0xb1   :  { %545 = vmatpush1.msra.mxu1 %v474_v5  ;;  %v643_v5 = vld [vmem:[#allocation5 + $0x50] sm:$0xff]  ;;  %920 = vmatprep.subr.mxu0 %v659_v4 }
  0xb2   :  { %546 = vmatprep.subr.mxu1 %v473_v6  ;;  %v658_v6 = vld [vmem:[#allocation5 + $0xc8] sm:$0xff]  ;;  %921 = vmatpush3.msra.mxu0 %v643_v5 }
  0xb3   :  { %547 = vmatpush1.msra.mxu1 %v472_v7  ;;  %v642_v7 = vld [vmem:[#allocation5 + $0x48] sm:$0xff]  ;;  %922 = vmatprep.subr.mxu0 %v658_v6 }
  0xb4   :  { %548 = vmatprep.subr.mxu1 %v471_v8  ;;  %v657_v8 = vld [vmem:[#allocation5 + $0xc0] sm:$0xff]  ;;  %923 = vmatpush3.msra.mxu0 %v642_v7 }
  0xb5   :  { %549 = vmatpush1.msra.mxu1 %v470_v9  ;;  %v641_v9 = vld [vmem:[#allocation5 + $0x40] sm:$0xff]  ;;  %924 = vmatprep.subr.mxu0 %v657_v8  ;;  %v765_v8 = vld [vmem:[%s1428_s11 + $0x30] sm:$0xff] }
  0xb6   :  { %550 = vmatprep.subr.mxu1 %v469_v10  ;;  %v656_v10 = vld [vmem:[#allocation5 + $0xb8] sm:$0xff]  ;;  %925 = vmatpush3.msra.mxu0 %v641_v9  ;;  %v764_v9 = vld [vmem:[%s1428_s11 + $0x28] sm:$0xff] }
  0xb7   :  { %551 = vmatpush1.msra.mxu1 %v468_v11  ;;  %v640_v11 = vld [vmem:[#allocation5 + $0x38] sm:$0xff]  ;;  %926 = vmatprep.subr.mxu0 %v656_v10  ;;  %v763_v10 = vld [vmem:[%s1428_s11 + $0x20] sm:$0xff] }
  0xb8   :  { %552 = vmatprep.subr.mxu1 %v467_v12  ;;  %v655_v12 = vld [vmem:[#allocation5 + $0xb0] sm:$0xff]  ;;  %927 = vmatpush3.msra.mxu0 %v640_v11  ;;  %v762_v11 = vld [vmem:[%s1428_s11 + $0x18] sm:$0xff] }
  0xb9   :  { %553 = vmatpush1.msra.mxu1 %v466_v13  ;;  %v639_v13 = vld [vmem:[#allocation5 + $0x30] sm:$0xff]  ;;  %928 = vmatprep.subr.mxu0 %v655_v12 }
  0xba   :  { %554 = vmatprep.subr.mxu1 %v465_v14  ;;  %929 = vmatpush3.msra.mxu0 %v639_v13  ;;  %v451_v14 = vpop.permute.xlu1 %450  ;;  %v761_v12 = vld [vmem:[%s1428_s11 + $0x10] sm:$0xff]  ;;  %v760_v13 = vld [vmem:[%s1428_s11 + $0x8] sm:$0xff] }
  0xbb   :  { %555 = vmatpush1.msra.mxu1 %v464_v15  ;;  %1066 = vrcp.f32 %v451_v14  ;;  %v759_v14 = vld [vmem:[%s1428_s11] sm:$0xff] }
  0xbc   :  { %556 = vmatprep.subr.mxu1 %v463_v16 }
  0xbd   :  { %557 = vmatpush1.msra.mxu1 %v462_v17 }
  0xbe   :  { %558 = vmatprep.subr.mxu1 %v461_v18 }
  0xbf   :  { %559 = vmatpush1.msra.mxu1 %v460_v19 }
  0xc0   :  { %560 = vmatprep.subr.mxu1 %v459_v20 }
  0xc1   :  { %561 = vmatpush1.msra.mxu1 %v458_v21 }
  0xc2   :  { %562 = vmatprep.subr.mxu1 %v457_v22 }
  0xc3   :  { %563 = vmatpush1.msra.mxu1 %v456_v23 }
  0xc4   :  { %564 = vmatprep.subr.mxu1 %v519_v24 }
  0xc5   :  { %565 = vmatpush2.msra.mxu1 %v518_v25 }
  0xc6   :  { %566 = vmatprep.subr.mxu1 %v517_v26 }
  0xc7   :  { %567 = vmatpush2.msra.mxu1 %v516_v27 }
  0xc8   :  { %568 = vmatprep.subr.mxu1 %v515_v28  ;;  %v1067_v20 = vpop.eup %1066  ;;  %v654_v28 = vld [vmem:[#allocation5 + $0xa8] sm:$0xff] }
  0xc9   :  { %569 = vmatpush2.msra.mxu1 %v514_v29  ;;  %930 = vmatprep.subr.mxu0 %v654_v28  ;;  %v638_v29 = vld [vmem:[#allocation5 + $0x28] sm:$0xff] }
  0xca   :  { %570 = vmatprep.subr.mxu1 %v513_v30  ;;  %931 = vmatpush3.msra.mxu0 %v638_v29  ;;  %v653_v30 = vld [vmem:[#allocation5 + $0xa0] sm:$0xff] }
  0xcb   :  { %571 = vmatpush2.msra.mxu1 %v512_v31  ;;  %932 = vmatprep.subr.mxu0 %v653_v30  ;;  %v637_v31 = vld [vmem:[#allocation5 + $0x20] sm:$0xff] }
  0xcc   :  { %572 = vmatprep.subr.mxu1 %v511_v32  ;;  %933 = vmatpush3.msra.mxu0 %v637_v31  ;;  %v652_v32 = vld [vmem:[#allocation5 + $0x98] sm:$0xff] }
  0xcd   :  { %573 = vmatpush2.msra.mxu1 %v510_v33  ;;  %934 = vmatprep.subr.mxu0 %v652_v32  ;;  %v636_v33 = vld [vmem:[#allocation5 + $0x18] sm:$0xff] }
  0xce   :  { %574 = vmatprep.subr.mxu1 %v509_v34  ;;  %935 = vmatpush3.msra.mxu0 %v636_v33  ;;  %v651_v34 = vld [vmem:[#allocation5 + $0x90] sm:$0xff] }
  0xcf   :  { %575 = vmatpush2.msra.mxu1 %v508_v35  ;;  %936 = vmatprep.subr.mxu0 %v651_v34  ;;  %v635_v35 = vld [vmem:[#allocation5 + $0x10] sm:$0xff] }
  0xd0   :  { %576 = vmatprep.subr.mxu1 %v507_v36  ;;  %v650_v36 = vld [vmem:[#allocation5 + $0x88] sm:$0xff]  ;;  %937 = vmatpush3.msra.mxu0 %v635_v35 }
  0xd1   :  { %577 = vmatpush2.msra.mxu1 %v506_v37  ;;  %v634_v37 = vld [vmem:[#allocation5 + $0x8] sm:$0xff]  ;;  %938 = vmatprep.subr.mxu0 %v650_v36 }
  0xd2   :  { %578 = vmatprep.subr.mxu1 %v505_v38  ;;  %v649_v38 = vld [vmem:[#allocation5 + $0x80] sm:$0xff]  ;;  %939 = vmatpush3.msra.mxu0 %v634_v37 }
  0xd3   :  { %579 = vmatpush2.msra.mxu1 %v504_v39  ;;  %v633_v39 = vld [vmem:[#allocation5] sm:$0xff]  ;;  %940 = vmatprep.subr.mxu0 %v649_v38 }
  0xd4   :  { %580 = vmatprep.subr.mxu1 %v503_v40  ;;  %941 = vmatpush3.msra.mxu0 %v633_v39  ;;  %v774_v40 = vld [vmem:[%s1428_s11 + $0x78] sm:$0xff] }
  0xd5   :  { %581 = vmatpush2.msra.mxu1 %v502_v41  ;;  %v773_v41 = vld [vmem:[%s1428_s11 + $0x70] sm:$0xff] }
  0xd6   :  { %582 = vmatprep.subr.mxu1 %v501_v42  ;;  %v772_v42 = vld [vmem:[%s1428_s11 + $0x68] sm:$0xff] }
  0xd7   :  { %583 = vmatpush2.msra.mxu1 %v500_v43  ;;  %v771_v43 = vld [vmem:[%s1428_s11 + $0x60] sm:$0xff] }
  0xd8   :  { %584 = vmatprep.subr.mxu1 %v499_v44  ;;  %v770_v44 = vld [vmem:[%s1428_s11 + $0x58] sm:$0xff] }
  0xd9   :  { %585 = vmatpush2.msra.mxu1 %v498_v45  ;;  %v769_v45 = vld [vmem:[%s1428_s11 + $0x50] sm:$0xff] }
  0xda   :  { %586 = vmatprep.subr.mxu1 %v497_v47  ;;  %v768_v47 = vld [vmem:[%s1428_s11 + $0x48] sm:$0xff] }
  0xdb   :  { %587 = vmatpush2.msra.mxu1 %v496_v48  ;;  %v767_v48 = vld [vmem:[%s1428_s11 + $0x40] sm:$0xff] }
  0xdc   :  { %588 = vmatprep.subr.mxu1 %v495_v49  ;;  %v766_v49 = vld [vmem:[%s1428_s11 + $0x38] sm:$0xff] }
  0xdd   :  { %589 = vmatpush2.msra.mxu1 %v494_v50  ;;  %v523_v50 = vshrl.u32 %v82_v46, 7 }
  0xde   :  { %590 = vmatprep.subr.mxu1 %v493_v51 }
  0xdf   :  { %591 = vmatpush2.msra.mxu1 %v492_v52  ;;  %v524_v51 = vsub.s32 0, %v523_v50  ;;  %v520_v52 = vld [vmem:[%s1421_s4] sm:$0x3] }
  0xe0   :  { %592 = vmatprep.subr.mxu1 %v491_v54  ;;  %v528_v54 = vsub.s32 1, %v523_v50 }
  0xe1   :  { %593 = vmatpush2.msra.mxu1 %v490_v55  ;;  %v603_v55 = vld [vmem:[%s1422_s5] sm:$0x3]  ;;  %v622_v62 = vrot.slane %v617_v58, %v524_v51 }
  0xe2   :  { %594 = vmatprep.subr.mxu1 %v489_v56  ;;  %v525_v56 = vrot.slane %v520_v52, %v524_v51  ;;  %v529_v59 = vrot.slane %v520_v52, %v528_v54  ;;  %v612_v46 = vrot.slane %v603_v55, %v528_v54  ;;  %v626_v2 = vrot.slane %v617_v58, %v528_v54 }
  0xe3   :  { %595 = vmatpush2.msra.mxu1 %v488_v57  ;;  %v608_v57 = vrot.slane %v603_v55, %v524_v51 }
  0xe4   :  { %962 = vmatprep.subr.mxu1 %v1119_v53 }
 0x164   :  { %v428_v15 = vpop.f32.mrf.mxu1 }
 0x165   :  { %v387_v16 = vpop.f32.mrf.mxu0 }
 0x166   :  { %v430_v17 = vpop.f32.mrf.mxu1  ;;  %v429_v18 = vadd.f32 %v428_v15, %v387_v16  ;;  %v906_v16 = vld [vmem:[%s1425_s8] ss:$0 sm:$0xff] }
 0x167   :  { %v389_v19 = vpop.f32.mrf.mxu0 }
 0x168   :  { %v431_v21 = vadd.f32 %v430_v17, %v389_v19  ;;  %v432_v22 = vpop.f32.mrf.mxu1  ;;  %v454_v26 = vmul.f32 %v1067_v20, %v429_v18  ;;  %v907_v19 = vld [vmem:[%s1426_s9] ss:$0 sm:$0xff] }
 0x169   :  { %v391_v23 = vpop.f32.mrf.mxu0 }
 0x16a   :  { %v455_v24 = vmul.f32 %v1067_v20, %v431_v21  ;;  %v433_v25 = vpop.f32.mrf.mxu1  ;;  %v908_v21 = vld [vmem:[%s1427_s10] ss:$0 sm:$0xff] }
 0x16b   :  { %v392_v27 = vpop.f32.mrf.mxu0 }
 0x16c   :  { %596 = vmatprep.mubr.f32.mxu1 %v455_v24  ;;  %v909_v24 = vld [vmem:[%s1429_s12] ss:$0 sm:$0xff] }
 0x16d   :  { %597 = vmatmul.mubr.f32.vlgmr.msra.gmra.mxu1 %v454_v26 }
 0x16e   :  { %963 = vmatpush3.msra.mxu1 %v774_v40  ;;  %994 = vmatprep.mubr.msk.f32.mxu1 %vm1121_vm14, %v1119_v53 }
 0x16f   :  { %964 = vmatprep.subr.mxu1 %v1119_v53 }
 0x170   :  { %965 = vmatpush3.msra.mxu1 %v773_v41 }
 0x171   :  { %966 = vmatprep.subr.mxu1 %v1119_v53 }
 0x172   :  { %967 = vmatpush3.msra.mxu1 %v772_v42 }
 0x173   :  { %968 = vmatprep.subr.mxu1 %v1119_v53 }
 0x174   :  { %969 = vmatpush3.msra.mxu1 %v771_v43 }
 0x175   :  { %970 = vmatprep.subr.mxu1 %v1119_v53 }
 0x176   :  { %971 = vmatpush3.msra.mxu1 %v770_v44 }
 0x177   :  { %972 = vmatprep.subr.mxu1 %v1119_v53 }
 0x178   :  { %973 = vmatpush3.msra.mxu1 %v769_v45 }
 0x179   :  { %974 = vmatprep.subr.mxu1 %v1119_v53 }
 0x17a   :  { %975 = vmatpush3.msra.mxu1 %v768_v47 }
 0x17b   :  { %976 = vmatprep.subr.mxu1 %v1119_v53 }
 0x17c   :  { %977 = vmatpush3.msra.mxu1 %v767_v48 }
 0x17d   :  { %978 = vmatprep.subr.mxu1 %v1119_v53 }
 0x17e   :  { %979 = vmatpush3.msra.mxu1 %v766_v49 }
 0x17f   :  { %980 = vmatprep.subr.mxu1 %v1119_v53 }
 0x180   :  { %981 = vmatpush3.msra.mxu1 %v765_v8 }
 0x181   :  { %982 = vmatprep.subr.mxu1 %v1119_v53 }
 0x182   :  { %983 = vmatpush3.msra.mxu1 %v764_v9 }
 0x183   :  { %984 = vmatprep.subr.mxu1 %v1119_v53 }
 0x184   :  { %985 = vmatpush3.msra.mxu1 %v763_v10 }
 0x185   :  { %986 = vmatprep.subr.mxu1 %v1119_v53 }
 0x186   :  { %987 = vmatpush3.msra.mxu1 %v762_v11 }
 0x187   :  { %988 = vmatprep.subr.mxu1 %v1119_v53 }
 0x188   :  { %989 = vmatpush3.msra.mxu1 %v761_v12 }
 0x189   :  { %990 = vmatprep.subr.mxu1 %v1119_v53 }
 0x18a   :  { %991 = vmatpush3.msra.mxu1 %v760_v13 }
 0x18b   :  { %992 = vmatprep.subr.mxu1 %v1119_v53 }
 0x18c   :  { %993 = vmatpush3.msra.mxu1 %v759_v14 }
 0x22d   :  { %v598_v60 = vpop.f32.mrf.mxu1 }
 0x22e   :  { %v599_v61 = vadd.f32 %v598_v60, %v525_v56 }
 0x22f   :  { %v600_v63 = vpop.f32.mrf.mxu1 }
 0x230   :  { %v615_v0 = vmul.f32 %v608_v57, %v599_v61  ;;  %v601_v1 = vadd.f32 %v600_v63, %v529_v59 }
 0x232   :  { %v616_v3 = vmul.f32 %v612_v46, %v601_v1  ;;  %v629_v4 = vadd.f32 %v622_v62, %v615_v0 }
 0x234   :  { %v630_v5 = vadd.f32 %v626_v2, %v616_v3  ;;  %v631_v7 = vmax.f32 %v629_v4, 0.0 }
 0x236   :  { %v632_v6 = vmax.f32 %v630_v5, 0.0 }
 0x238   :  { %736 = vmatprep.mubr.f32.mxu0 %v632_v6 }
 0x239   :  { %737 = vmatmul.mubr.f32.vlgmr.msra.gmra.mxu0 %v631_v7 }
 0x2f9   :  { %v942_v15 = vpop.f32.mrf.mxu0 }
 0x2fb   :  { %v943_v17 = vpop.f32.mrf.mxu0 }
 0x2fc   :  { %v944_v18 = vadd.f32 %v943_v17, %v942_v15 }
 0x2fe   :  { %v739_v20 = vadd.f32 %v944_v18, %v906_v16 }
 0x300   :  { %v749_v22 = vmul.f32 %v907_v19, %v739_v20 }
 0x302   :  { %v757_v23 = vadd.f32 %v908_v21, %v749_v22 }
 0x304   :  { %v758_v53 = vmax.f32 %v757_v23, 0.0 }
 0x306   :  { %995 = vmatmul.mubr.f32.vlgmr.msra.gmra.mxu1 %v758_v53 }
 0x3c6   :  { %v848_v25 = vpop.f32.mrf.mxu1 }
 0x3c7   :  { %v849_v26 = vadd.f32 %v909_v24, %v848_v25 }
 0x3c8   :  { %v996_v27 = vpop.f32.mrf.mxu1 }
 0x3c9   :  { %852 = vst [vmem:[%s1430_s13] sm:$0xff] %v849_v26 }
 0x3ca   :  { %857 = vsyncpa [#allocation4], 1 }
 0x3cb   :  { %858 = vsyncpa [#allocation6], 1 }

</bundles_post_ra>
